<compile_context>
chip_gen: v6e
topology: v6e:2x2x1
jax: 0.10.0
libtpu: 0.0.40
codegen_flags: <defaults>
</compile_context>

<pallas_src>
import jax
import jax.numpy as jnp
from jax.experimental import pallas as pl
from jax.experimental.pallas import tpu as pltpu


def qnetwork_kernel(x_ref, *rest):
    """rest = (w0, b0, w1, b1, ..., wL_col, bL, out_ref).

    x_ref:  (in_dim, TILE_B)  -- batch on lanes.
    wi:     (out, in) native layout; bi: (out, 1).
    wL_col: (hidden, 1) column for the final 1-wide layer; bL: (1, 1).
    """
    out_ref = rest[-1]
    prefs = rest[:-1]
    n_layers = len(prefs) // 2

    h = x_ref[...]                                   # (in_dim, tb) f32
    # All layers except the last: MXU matmul + bias + ReLU, activations (out, tb).
    for i in range(n_layers - 1):
        w = prefs[2 * i][...]                        # (out, in)
        b = prefs[2 * i + 1][...]                    # (out, 1)
        h = jnp.maximum(
            jnp.dot(w, h, preferred_element_type=jnp.float32) + b, 0.0
        )
    # Final 1-wide layer: VPU multiply + sublane reduce (no N=1 MXU pass),
    # identity activation.
    wl = prefs[-2][...]                              # (hidden, 1)
    bl = prefs[-1][...]                              # (1, 1)
    q = jnp.sum(wl * h, axis=0, keepdims=True) + bl  # (1, tb)
    out_ref[...] = q.astype(out_ref.dtype)


def make_qnetwork_params(key, state_dim, action_dim, hidden_size, hidden_layers):
    """Deterministic parameter init matching nn.Linear layer shapes (out, in)."""
    dims = [state_dim + action_dim] + [hidden_size] * (hidden_layers + 1) + [1]
    params = []
    for i in range(len(dims) - 1):
        fan_in, fan_out = dims[i], dims[i + 1]
        key, kw, kb = jax.random.split(key, 3)
        bound = 1.0 / jnp.sqrt(fan_in)
        w = jax.random.uniform(kw, (fan_out, fan_in), jnp.float32, -bound, bound)
        b = jax.random.uniform(kb, (fan_out,), jnp.float32, -bound, bound)
        params.append((w, b))
    return params


def prepare_params(params):
    """One-time layout prep, hoisted out of the forward hot path.

    Hidden-layer weights keep the native (out, in) layout; biases become
    (out, 1) columns; the final layer's (1, hidden) weight is stored as a
    (hidden, 1) column for the in-kernel VPU reduce.
    """
    n = len(params)
    flat = []
    for i, (w, b) in enumerate(params):
        w = jnp.asarray(w, jnp.float32)
        b = jnp.asarray(b, jnp.float32)
        if i < n - 1:
            flat.append(w)                     # (out, in)
            flat.append(b.reshape(-1, 1))      # (out, 1)
        else:
            flat.append(w.reshape(-1, 1))      # (hidden, 1) == w.T since out == 1
            flat.append(b.reshape(1, 1))       # (1, 1)
    return tuple(flat)


def _round_up(x, m):
    return (x + m - 1) // m * m


def qnetwork_forward(state, action, flat_params, *, tile_b=4096):
    """Q(s, a) forward pass. `flat_params` comes from prepare_params()."""
    batch = state.shape[0]

    # Batch-on-lanes input: (state_dim + action_dim, batch). One small fused
    # concat+transpose in the wrapper replaces per-call weight transposes,
    # padding copies and the split first-layer matmul.
    x = jnp.concatenate(
        [state.astype(jnp.float32), action.astype(jnp.float32)], axis=1
    ).T
    in_dim = x.shape[0]

    # Lane tile: multiple of 128; aim for >= 2 grid steps so both v7x
    # TensorCores get work; collapse to one full-extent block for tiny batches.
    tb = max(128, _round_up(max(1, tile_b), 128))
    tb = min(tb, max(128, _round_up(pl.cdiv(batch, 2), 128)))
    if batch <= tb:
        tb = batch
    grid = (pl.cdiv(batch, tb),)

    # Weights/biases: full-array blocks, constant index -> VMEM-resident.
    param_specs = [pl.BlockSpec(p.shape, lambda i: (0, 0)) for p in flat_params]

    out = pl.pallas_call(
        qnetwork_kernel,
        out_shape=jax.ShapeDtypeStruct((1, batch), jnp.float32),
        grid=grid,
        in_specs=[pl.BlockSpec((in_dim, tb), lambda i: (0, i))] + param_specs,
        out_specs=pl.BlockSpec((1, tb), lambda i: (0, i)),
        compiler_params=pltpu.CompilerParams(
            dimension_semantics=("parallel",),
        ),
    )(x, *flat_params)

    return out.T  # (batch, 1), matching the PyTorch module's output shape


def qnetwork_reference(state, action, params):
    """Pure-JAX reference implementing the same forward pass."""
    h = jnp.concatenate([state, action], axis=1).astype(jnp.float32)
    n = len(params)
    for i, (w, b) in enumerate(params):
        h = h @ w.T + b
        if i < n - 1:
            h = jnp.maximum(h, 0.0)
    return h


if __name__ == "__main__":
    # Small shapes consistent with QNetwork(state_dim, action_dim, hidden, layers).
    state_dim, action_dim = 6, 2
    hidden_size, hidden_layers = 32, 2

    key = jax.random.PRNGKey(0)
    kp, ks, ka = jax.random.split(key, 3)
    params = make_qnetwork_params(kp, state_dim, action_dim, hidden_size, hidden_layers)
    flat = prepare_params(params)  # one-time prep, hoisted out of the hot path

    # Case 1: tiny batch -> single full-extent block, grid = 1.
    batch = 8
    state = jax.random.normal(ks, (batch, state_dim), jnp.float32)
    action = jax.random.normal(ka, (batch, action_dim), jnp.float32)
    out = jax.block_until_ready(qnetwork_forward(state, action, flat))
    ref = qnetwork_reference(state, action, params)
    assert out.shape == (batch, 1), out.shape
    assert jnp.allclose(out, ref, atol=1e-5, rtol=1e-5), (out, ref)

    # Case 2: batch > lane tile -> multi-step grid with a ragged (masked) last block.
    batch2 = 300
    ks2, ka2 = jax.random.split(jax.random.PRNGKey(1))
    state2 = jax.random.normal(ks2, (batch2, state_dim), jnp.float32)
    action2 = jax.random.normal(ka2, (batch2, action_dim), jnp.float32)
    out2 = jax.block_until_ready(qnetwork_forward(state2, action2, flat, tile_b=128))
    ref2 = qnetwork_reference(state2, action2, params)
    assert out2.shape == (batch2, 1), out2.shape
    assert jnp.allclose(out2, ref2, atol=1e-5, rtol=1e-5), (out2, ref2)

    print("KERNEL_OK")
</pallas_src>

<mosaic_0001>
module attributes {stable_mosaic.version = 11 : i64} {
  func.func @qnetwork_kernel(%arg0: i32, %arg1: memref<8x8xf32, #tpu.memory_space<vmem>>, %arg2: memref<32x8xf32, #tpu.memory_space<vmem>>, %arg3: memref<32x1xf32, #tpu.memory_space<vmem>>, %arg4: memref<32x32xf32, #tpu.memory_space<vmem>>, %arg5: memref<32x1xf32, #tpu.memory_space<vmem>>, %arg6: memref<32x32xf32, #tpu.memory_space<vmem>>, %arg7: memref<32x1xf32, #tpu.memory_space<vmem>>, %arg8: memref<32x1xf32, #tpu.memory_space<vmem>>, %arg9: memref<1x1xf32, #tpu.memory_space<vmem>>, %arg10: memref<1x8xf32, #tpu.memory_space<vmem>>) attributes {dimension_semantics = [#tpu.dimension_semantics<parallel>], iteration_bounds = array<i64: 1>, scalar_prefetch = 0 : i64, scratch_operands = 0 : i64, tpu.core_type = #tpu.core_type<tc>, window_params = [{transform_indices = @transform_0, window_bounds = array<i64: 8, 8>}, {pipeline_mode = #tpu.pipeline_mode<synchronous>, transform_indices = @transform_1, window_bounds = array<i64: 32, 8>}, {pipeline_mode = #tpu.pipeline_mode<synchronous>, transform_indices = @transform_2, window_bounds = array<i64: 32, 1>}, {pipeline_mode = #tpu.pipeline_mode<synchronous>, transform_indices = @transform_3, window_bounds = array<i64: 32, 32>}, {pipeline_mode = #tpu.pipeline_mode<synchronous>, transform_indices = @transform_4, window_bounds = array<i64: 32, 1>}, {pipeline_mode = #tpu.pipeline_mode<synchronous>, transform_indices = @transform_5, window_bounds = array<i64: 32, 32>}, {pipeline_mode = #tpu.pipeline_mode<synchronous>, transform_indices = @transform_6, window_bounds = array<i64: 32, 1>}, {pipeline_mode = #tpu.pipeline_mode<synchronous>, transform_indices = @transform_7, window_bounds = array<i64: 32, 1>}, {pipeline_mode = #tpu.pipeline_mode<synchronous>, transform_indices = @transform_8, window_bounds = array<i64: 1, 1>}, {transform_indices = @transform_9, window_bounds = array<i64: 1, 8>}]} {
    %c0 = arith.constant 0 : index
    %c0_0 = arith.constant 0 : index
    %0 = vector.load %arg1[%c0, %c0_0] : memref<8x8xf32, #tpu.memory_space<vmem>>, vector<8x8xf32>
    %c0_1 = arith.constant 0 : index
    %c0_2 = arith.constant 0 : index
    %1 = vector.load %arg2[%c0_1, %c0_2] : memref<32x8xf32, #tpu.memory_space<vmem>>, vector<32x8xf32>
    %c0_3 = arith.constant 0 : index
    %c0_4 = arith.constant 0 : index
    %2 = vector.load %arg3[%c0_3, %c0_4] : memref<32x1xf32, #tpu.memory_space<vmem>>, vector<32x1xf32>
    %cst = arith.constant dense<0.000000e+00> : vector<32x8xf32>
    %3 = tpu.matmul %1, %0, %cst {dimension_numbers = #tpu.dot_dimension_numbers<[1], [0], [0], [1], [0, 0, 1, 1], [], []>} : vector<32x8xf32>, vector<8x8xf32>, vector<32x8xf32> -> vector<32x8xf32>
    %4 = vector.broadcast %2 : vector<32x1xf32> to vector<32x8xf32>
    %5 = arith.addf %3, %4 : vector<32x8xf32>
    %cst_5 = arith.constant 0.000000e+00 : f32
    %6 = vector.broadcast %cst_5 : f32 to vector<32x8xf32>
    %7 = arith.maximumf %5, %6 : vector<32x8xf32>
    %c0_6 = arith.constant 0 : index
    %c0_7 = arith.constant 0 : index
    %8 = vector.load %arg4[%c0_6, %c0_7] : memref<32x32xf32, #tpu.memory_space<vmem>>, vector<32x32xf32>
    %c0_8 = arith.constant 0 : index
    %c0_9 = arith.constant 0 : index
    %9 = vector.load %arg5[%c0_8, %c0_9] : memref<32x1xf32, #tpu.memory_space<vmem>>, vector<32x1xf32>
    %cst_10 = arith.constant dense<0.000000e+00> : vector<32x8xf32>
    %10 = tpu.matmul %8, %7, %cst_10 {dimension_numbers = #tpu.dot_dimension_numbers<[1], [0], [0], [1], [0, 0, 1, 1], [], []>} : vector<32x32xf32>, vector<32x8xf32>, vector<32x8xf32> -> vector<32x8xf32>
    %11 = vector.broadcast %9 : vector<32x1xf32> to vector<32x8xf32>
    %12 = arith.addf %10, %11 : vector<32x8xf32>
    %cst_11 = arith.constant 0.000000e+00 : f32
    %13 = vector.broadcast %cst_11 : f32 to vector<32x8xf32>
    %14 = arith.maximumf %12, %13 : vector<32x8xf32>
    %c0_12 = arith.constant 0 : index
    %c0_13 = arith.constant 0 : index
    %15 = vector.load %arg6[%c0_12, %c0_13] : memref<32x32xf32, #tpu.memory_space<vmem>>, vector<32x32xf32>
    %c0_14 = arith.constant 0 : index
    %c0_15 = arith.constant 0 : index
    %16 = vector.load %arg7[%c0_14, %c0_15] : memref<32x1xf32, #tpu.memory_space<vmem>>, vector<32x1xf32>
    %cst_16 = arith.constant dense<0.000000e+00> : vector<32x8xf32>
    %17 = tpu.matmul %15, %14, %cst_16 {dimension_numbers = #tpu.dot_dimension_numbers<[1], [0], [0], [1], [0, 0, 1, 1], [], []>} : vector<32x32xf32>, vector<32x8xf32>, vector<32x8xf32> -> vector<32x8xf32>
    %18 = vector.broadcast %16 : vector<32x1xf32> to vector<32x8xf32>
    %19 = arith.addf %17, %18 : vector<32x8xf32>
    %cst_17 = arith.constant 0.000000e+00 : f32
    %20 = vector.broadcast %cst_17 : f32 to vector<32x8xf32>
    %21 = arith.maximumf %19, %20 : vector<32x8xf32>
    %c0_18 = arith.constant 0 : index
    %c0_19 = arith.constant 0 : index
    %22 = vector.load %arg8[%c0_18, %c0_19] : memref<32x1xf32, #tpu.memory_space<vmem>>, vector<32x1xf32>
    %c0_20 = arith.constant 0 : index
    %c0_21 = arith.constant 0 : index
    %23 = vector.load %arg9[%c0_20, %c0_21] : memref<1x1xf32, #tpu.memory_space<vmem>>, vector<1x1xf32>
    %24 = vector.broadcast %22 : vector<32x1xf32> to vector<32x8xf32>
    %25 = arith.mulf %24, %21 : vector<32x8xf32>
    %cst_22 = arith.constant dense<0.000000e+00> : vector<8xf32>
    %26 = vector.multi_reduction <add>, %25, %cst_22 [0] : vector<32x8xf32> to vector<8xf32>
    %27 = vector.shape_cast %26 : vector<8xf32> to vector<1x8xf32>
    %28 = vector.broadcast %23 : vector<1x1xf32> to vector<1x8xf32>
    %29 = arith.addf %27, %28 : vector<1x8xf32>
    %c0_23 = arith.constant 0 : index
    %c0_24 = arith.constant 0 : index
    %30 = vector.load %arg10[%c0_23, %c0_24] : memref<1x8xf32, #tpu.memory_space<vmem>>, vector<1x8xf32>
    tpu.vector_store %arg10[%c0_23, %c0_24], %29 {strides = array<i32>} : memref<1x8xf32, #tpu.memory_space<vmem>>, vector<1x8xf32>,
    return
  }
  func.func @transform_0(%arg0: i32) -> (i32, i32) {
    %c0_i32 = arith.constant 0 : i32
    %c0_i32_0 = arith.constant 0 : i32
    return %c0_i32, %arg0 : i32, i32
  }
  func.func @transform_1(%arg0: i32) -> (i32, i32) {
    %c0_i32 = arith.constant 0 : i32
    %c0_i32_0 = arith.constant 0 : i32
    %c0_i32_1 = arith.constant 0 : i32
    return %c0_i32, %c0_i32_0 : i32, i32
  }
  func.func @transform_2(%arg0: i32) -> (i32, i32) {
    %c0_i32 = arith.constant 0 : i32
    %c0_i32_0 = arith.constant 0 : i32
    %c0_i32_1 = arith.constant 0 : i32
    return %c0_i32, %c0_i32_0 : i32, i32
  }
  func.func @transform_3(%arg0: i32) -> (i32, i32) {
    %c0_i32 = arith.constant 0 : i32
    %c0_i32_0 = arith.constant 0 : i32
    %c0_i32_1 = arith.constant 0 : i32
    return %c0_i32, %c0_i32_0 : i32, i32
  }
  func.func @transform_4(%arg0: i32) -> (i32, i32) {
    %c0_i32 = arith.constant 0 : i32
    %c0_i32_0 = arith.constant 0 : i32
    %c0_i32_1 = arith.constant 0 : i32
    return %c0_i32, %c0_i32_0 : i32, i32
  }
  func.func @transform_5(%arg0: i32) -> (i32, i32) {
    %c0_i32 = arith.constant 0 : i32
    %c0_i32_0 = arith.constant 0 : i32
    %c0_i32_1 = arith.constant 0 : i32
    return %c0_i32, %c0_i32_0 : i32, i32
  }
  func.func @transform_6(%arg0: i32) -> (i32, i32) {
    %c0_i32 = arith.constant 0 : i32
    %c0_i32_0 = arith.constant 0 : i32
    %c0_i32_1 = arith.constant 0 : i32
    return %c0_i32, %c0_i32_0 : i32, i32
  }
  func.func @transform_7(%arg0: i32) -> (i32, i32) {
    %c0_i32 = arith.constant 0 : i32
    %c0_i32_0 = arith.constant 0 : i32
    %c0_i32_1 = arith.constant 0 : i32
    return %c0_i32, %c0_i32_0 : i32, i32
  }
  func.func @transform_8(%arg0: i32) -> (i32, i32) {
    %c0_i32 = arith.constant 0 : i32
    %c0_i32_0 = arith.constant 0 : i32
    %c0_i32_1 = arith.constant 0 : i32
    return %c0_i32, %c0_i32_0 : i32, i32
  }
  func.func @transform_9(%arg0: i32) -> (i32, i32) {
    %c0_i32 = arith.constant 0 : i32
    %c0_i32_0 = arith.constant 0 : i32
    return %c0_i32, %arg0 : i32, i32
  }
}

</mosaic_0001>

<bundles_post_ra>
// kernel: tpu_custom_call.1
= control target key start
LH: loop header
LB: loop body
LE: loop exit
PB: predicated region body
PF: predicated region fallthrough
CT: control target
= control target key end

     0   :  { %s749_s0 = inlined_call_operand.vmem [shape: f32[8,8], index: 0, kind: input, shape index: {}]   ;;  %s750_s1 = inlined_call_operand.vmem [shape: f32[32,8], index: 1, kind: input, shape index: {}]   ;;  %s751_s2 = inlined_call_operand.vmem [shape: f32[32,1], index: 2, kind: input, shape index: {}]   ;;  %s752_s3 = inlined_call_operand.vmem [shape: f32[32,32], index: 3, kind: input, shape index: {}]   ;;  %s753_s4 = inlined_call_operand.vmem [shape: f32[32,1], index: 4, kind: input, shape index: {}]   ;;  %s754_s5 = inlined_call_operand.vmem [shape: f32[32,32], index: 5, kind: input, shape index: {}]   ;;  %s755_s6 = inlined_call_operand.vmem [shape: f32[32,1], index: 6, kind: input, shape index: {}]   ;;  %s756_s7 = inlined_call_operand.vmem [shape: f32[32,1], index: 7, kind: input, shape index: {}]   ;;  %s757_s8 = inlined_call_operand.<no memory space> [shape: f32[1,1], index: 8, kind: input, shape index: {}]   ;;  %s758_s9 = inlined_call_operand.hbm [shape: f32[1,8], index: 9, kind: output, shape index: {}]  }
   0x1   :  { %v14_v0 = vstv %s757_s8 }
   0x2   :  { %15 = vst [vmem:[#allocation2] sm:$0x1] %v14_v0 }
   0x3   :  { %v35_v1 = vld [vmem:[%s749_s0] sm:$0xff]  ;;  %vm64_vm0 = vcmask 64512   ;;  %v37_v3 = vld [vmem:[%s750_s1 + $0x8] sm:$0xff]  ;;  %v38_v4 = vld [vmem:[%s750_s1 + $0x10] sm:$0xff]  ;;  %v588_v6 = vmov 0  }
   0x4   :  { %v36_v2 = vld [vmem:[%s750_s1] sm:$0xff]  ;;  %526 = vmatprep.subr.mxu0 %v35_v1  ;;  %v43_v5 = vld [vmem:[%s751_s2 + $0x18] sm:$0xff]  ;;  %564 = vset.pattern.permute.xlu0 %v588_v6  ;;  %v41_v7 = vld [vmem:[%s751_s2 + $0x8] sm:$0xff] }
   0x5   :  { %528 = vmatprep.mubr.msk.f32.mxu0 %vm64_vm0, %v36_v2  ;;  %527 = vmatpush3.msra.mxu0 %v35_v1  ;;  %v39_v8 = vld [vmem:[%s750_s1 + $0x18] sm:$0xff]  ;;  %v42_v9 = vld [vmem:[%s751_s2 + $0x10] sm:$0xff]  ;;  %v40_v10 = vld [vmem:[%s751_s2] sm:$0xff] }
   0x6   :  { %529 = vmatmul.mubr.msk.f32.vlgmr.msra.gmra.mxu0 %vm64_vm0, %v37_v3  ;;  %61 = vperm.xlu0 %564, %v43_v5  }
   0x7   :  { %531 = vmatprep.mubr.msk.f32.mxu0 %vm64_vm0, %v38_v4  ;;  %565 = vset.pattern.permute.xlu1 %v588_v6 }
   0x8   :  { %51 = vperm.xlu1 %565, %v41_v7  }
   0xa   :  { %532 = vmatmul.mubr.msk.f32.gmra.mxu0 %vm64_vm0, %v39_v8  ;;  %56 = vperm.xlu0 %564, %v42_v9  }
   0xb   :  { %16 = vsyncpa [#allocation4], 0  ;;  %v173_v11 = vld [vmem:[%s753_s4 + $0x18] sm:$0xff]  ;;  %v172_v12 = vld [vmem:[%s753_s4 + $0x10] sm:$0xff]  ;;  %vm194_vm1 = vcmask 261120   ;;  %vm477_vm2 = vcmask 57344  }
   0xc   :  { %46 = vperm.xlu1 %565, %v40_v10   ;;  %v171_v13 = vld [vmem:[%s753_s4 + $0x8] sm:$0xff]  ;;  %v170_v14 = vld [vmem:[%s753_s4] sm:$0xff]  ;;  %v302_v17 = vld [vmem:[%s755_s6 + $0x10] sm:$0xff] }
   0xd   :  { %v300_v15 = vld [vmem:[%s755_s6] sm:$0xff]  ;;  %v301_v16 = vld [vmem:[%s755_s6 + $0x8] sm:$0xff]  ;;  %v303_v18 = vld [vmem:[%s755_s6 + $0x18] sm:$0xff] }
   0xe   :  { %191 = vperm.xlu0 %564, %v173_v11   ;;  %v425_v19 = vld [vmem:[%s756_s7] sm:$0xff]  ;;  %v426_v20 = vld [vmem:[%s756_s7 + $0x8] sm:$0xff]  ;;  %v427_v21 = vld [vmem:[%s756_s7 + $0x10] sm:$0xff] }
   0xf   :  { %v428_v22 = vld [vmem:[%s756_s7 + $0x18] sm:$0xff]  ;;  %v429_v23 = vld [vmem:[#allocation2] sm:$0x1]  ;;  %v167_v41 = vld [vmem:[%s752_s3 + $0x8] sm:$0xff] }
  0x10   :  { %186 = vperm.xlu1 %565, %v172_v12   ;;  %v166_v24 = vld [vmem:[%s752_s3] sm:$0xff]  ;;  %v168_v42 = vld [vmem:[%s752_s3 + $0x10] sm:$0xff]  ;;  %v169_v43 = vld [vmem:[%s752_s3 + $0x18] sm:$0xff] }
  0x11   :  { %542 = vmatprep.mubr.msk.f32.mxu1 %vm194_vm1, %v166_v24  ;;  %v296_v44 = vld [vmem:[%s754_s5] sm:$0xff]  ;;  %v297_v61 = vld [vmem:[%s754_s5 + $0x8] sm:$0xff]  ;;  %v298_v62 = vld [vmem:[%s754_s5 + $0x10] sm:$0xff] }
  0x12   :  { %181 = vperm.xlu0 %564, %v171_v13   ;;  %556 = vmatprep.mubr.msk.f32.mxu0 %vm194_vm1, %v296_v44  ;;  %v299_v63 = vld [vmem:[%s754_s5 + $0x18] sm:$0xff]  ;;  %s589_s5 = smov [#allocation3]  }
  0x13   :  { %s485_s15 = sshll.u32 %s589_s5, 4  ;;  %s486_s15 = int_to_ptr.vmem [resolvable:$true] %s485_s15 }
  0x14   :  { %176 = vperm.xlu1 %565, %v170_v14   ;;  %s566_s16 = scalar_lea.vmem %s486_s15, 16  ;;  %s570_s17 = scalar_lea.vmem %s486_s15, 32 }
  0x15   :  { %p567_p0 = scmp.ne.s32.totalorder %s486_s15, %s566_s16  ;;  %p571_p1 = scmp.lt.s32.totalorder %s486_s15, %s486_s15 }
  0x16   :  { %306 = vperm.xlu0 %564, %v300_v15   ;;  %p572_p2 = scmp.lt.s32.totalorder %s570_s17, %s566_s16 }
  0x18   :  { %311 = vperm.xlu1 %565, %v301_v16   ;;  %p573_p3 = por %p572_p2, %p571_p1 }
  0x1a   :  { %316 = vperm.xlu0 %564, %v302_v17   ;;  %p574_p4 = pnand %p573_p3, %p567_p0 }
  0x1c   :  { %321 = vperm.xlu1 %565, %v303_v18  }
  0x1e   :  { %432 = vperm.xlu0 %564, %v425_v19  }
  0x20   :  { %437 = vperm.xlu1 %565, %v426_v20  }
  0x22   :  { %442 = vperm.xlu0 %564, %v427_v21  }
  0x24   :  { %447 = vperm.xlu1 %565, %v428_v22  }
  0x26   :  { %469 = vperm.xlu0 %564, %v429_v23  }
  0x81   :  { %v62_v25 = vpop.permute.xlu0 %61 }
  0x83   :  { %v52_v27 = vpop.permute.xlu1 %51 }
  0x85   :  { %v57_v31 = vpop.permute.xlu0 %56 }
  0x87   :  { %v47_v36 = vpop.permute.xlu1 %46 }
  0x89   :  { %v192_v45 = vpop.permute.xlu0 %191 }
  0x8b   :  { %v187_v47 = vpop.permute.xlu1 %186 }
  0x8d   :  { %v182_v51 = vpop.permute.xlu0 %181 }
  0x8f   :  { %v177_v56 = vpop.permute.xlu1 %176 }
  0x91   :  { %v307_v0 = vpop.permute.xlu0 %306 }
  0x93   :  { %v312_v1 = vpop.permute.xlu1 %311 }
  0x95   :  { %v317_v2 = vpop.permute.xlu0 %316 }
  0x97   :  { %v322_v3 = vpop.permute.xlu1 %321 }
  0x99   :  { %v433_v7 = vpop.permute.xlu0 %432 }
  0x9b   :  { %v438_v10 = vpop.permute.xlu1 %437 }
  0x9d   :  { %v443_v21 = vpop.permute.xlu0 %442 }
  0x9f   :  { %v448_v22 = vpop.permute.xlu1 %447 }
  0xc6   :  { %v530_v26 = vpop.f32.mrf.mxu0 }
  0xc7   :  { %v149_v33 = vadd.f32 %v530_v26, %v52_v27 }
  0xc8   :  { %v143_v28 = vpop.f32.mrf.mxu0 }
  0xc9   :  { %v144_v37 = vadd.f32 %v143_v28, %v47_v36  ;;  %v163_v39 = vmax.f32 %v149_v33, 0.0 }
  0xca   :  { %v533_v29 = vpop.f32.mrf.mxu0 }
  0xcb   :  { %v159_v30 = vadd.f32 %v533_v29, %v62_v25  ;;  %v162_v40 = vmax.f32 %v144_v37, 0.0 }
  0xcc   :  { %v153_v32 = vpop.f32.mrf.mxu0 }
  0xcd   :  { %v165_v34 = vmax.f32 %v159_v30, 0.0  ;;  %v154_v35 = vadd.f32 %v153_v32, %v57_v31  ;;  %v472_v30 = vlaneseq }
  0xcf   :  { %v164_v38 = vmax.f32 %v154_v35, 0.0  ;;  %534 = vmatprep.subr.mxu1 %v165_v34  ;;  %v473_v33 = vshrl.u32 %v472_v30, 7 }
  0xd0   :  { %535 = vmatpush3.msra.mxu1 %v165_v34 }
  0xd1   :  { %536 = vmatprep.subr.mxu1 %v164_v38  ;;  %v474_v36 = vsub.s32 0, %v473_v33 }
  0xd2   :  { %537 = vmatpush3.msra.mxu1 %v164_v38  ;;  %v470_v38 = vpop.permute.xlu0 %469 }
  0xd3   :  { %538 = vmatprep.subr.mxu1 %v163_v39 }
  0xd4   :  { %539 = vmatpush3.msra.mxu1 %v163_v39 }
  0xd5   :  { %540 = vmatprep.subr.mxu1 %v162_v40 }
  0xd6   :  { %541 = vmatpush3.msra.mxu1 %v162_v40  ;;  %v475_v40 = vrot.slane %v470_v38, %v474_v36 }
  0xd7   :  { %543 = vmatmul.mubr.msk.f32.vlgmr.msra.gmra.mxu1 %vm194_vm1, %v167_v41 }
  0xd8   :  { %545 = vmatprep.mubr.msk.f32.mxu1 %vm194_vm1, %v168_v42 }
  0xdb   :  { %546 = vmatmul.mubr.msk.f32.gmra.mxu1 %vm194_vm1, %v169_v43 }
 0x197   :  { %v544_v46 = vpop.f32.mrf.mxu1 }
 0x198   :  { %v279_v53 = vadd.f32 %v544_v46, %v182_v51 }
 0x199   :  { %v273_v48 = vpop.f32.mrf.mxu1 }
 0x19a   :  { %v274_v57 = vadd.f32 %v273_v48, %v177_v56  ;;  %v293_v59 = vmax.f32 %v279_v53, 0.0 }
 0x19b   :  { %v547_v49 = vpop.f32.mrf.mxu1 }
 0x19c   :  { %v289_v50 = vadd.f32 %v547_v49, %v192_v45  ;;  %v292_v60 = vmax.f32 %v274_v57, 0.0 }
 0x19d   :  { %v283_v52 = vpop.f32.mrf.mxu1 }
 0x19e   :  { %v295_v54 = vmax.f32 %v289_v50, 0.0  ;;  %v284_v55 = vadd.f32 %v283_v52, %v187_v47 }
 0x1a0   :  { %v294_v58 = vmax.f32 %v284_v55, 0.0  ;;  %548 = vmatprep.subr.mxu0 %v295_v54 }
 0x1a1   :  { %549 = vmatpush3.msra.mxu0 %v295_v54 }
 0x1a2   :  { %550 = vmatprep.subr.mxu0 %v294_v58 }
 0x1a3   :  { %551 = vmatpush3.msra.mxu0 %v294_v58 }
 0x1a4   :  { %552 = vmatprep.subr.mxu0 %v293_v59 }
 0x1a5   :  { %553 = vmatpush3.msra.mxu0 %v293_v59 }
 0x1a6   :  { %554 = vmatprep.subr.mxu0 %v292_v60 }
 0x1a7   :  { %555 = vmatpush3.msra.mxu0 %v292_v60 }
 0x1a8   :  { %557 = vmatmul.mubr.msk.f32.vlgmr.msra.gmra.mxu0 %vm194_vm1, %v297_v61 }
 0x1a9   :  { %559 = vmatprep.mubr.msk.f32.mxu0 %vm194_vm1, %v298_v62 }
 0x1ac   :  { %560 = vmatmul.mubr.msk.f32.gmra.mxu0 %vm194_vm1, %v299_v63 }
 0x268   :  { %v558_v4 = vpop.f32.mrf.mxu0 }
 0x269   :  { %v408_v5 = vadd.f32 %v558_v4, %v312_v1 }
 0x26a   :  { %v402_v6 = vpop.f32.mrf.mxu0 }
 0x26b   :  { %v422_v8 = vmax.f32 %v408_v5, 0.0  ;;  %v403_v9 = vadd.f32 %v402_v6, %v307_v0 }
 0x26c   :  { %v561_v11 = vpop.f32.mrf.mxu0 }
 0x26d   :  { %v421_v12 = vmax.f32 %v403_v9, 0.0  ;;  %v418_v13 = vadd.f32 %v561_v11, %v322_v3  ;;  %v451_v15 = vmul.f32 %v438_v10, %v422_v8 }
 0x26e   :  { %v412_v14 = vpop.f32.mrf.mxu0 }
 0x26f   :  { %v450_v16 = vmul.f32 %v433_v7, %v421_v12  ;;  %v424_v17 = vmax.f32 %v418_v13, 0.0  ;;  %v413_v18 = vadd.f32 %v412_v14, %v317_v2  ;;  %v455_v23 = vsel %vm64_vm0, %v451_v15, 0.0 }
 0x271   :  { %v454_v19 = vsel %vm64_vm0, %v450_v16, 0.0  ;;  %v423_v20 = vmax.f32 %v413_v18, 0.0  ;;  %v453_v24 = vmul.f32 %v448_v22, %v424_v17 }
 0x272   :  { %v456_v26 = vadd.f32 %v455_v23, %v454_v19 }
 0x273   :  { %v452_v25 = vmul.f32 %v443_v21, %v423_v20  ;;  %v459_v29 = vsel %vm64_vm0, %v453_v24, 0.0 }
 0x275   :  { %v457_v27 = vsel %vm64_vm0, %v452_v25, 0.0 }
 0x276   :  { %v458_v28 = vadd.f32 %v457_v27, %v456_v26 }
 0x278   :  { %v460_v31 = vadd.f32 %v459_v29, %v458_v28 }
 0x27a   :  { %v461_v32 = vrot.slane %v460_v31, 4 }
 0x27c   :  { %v462_v34 = vadd.f32 %v461_v32, %v460_v31 }
 0x27e   :  { %v463_v35 = vrot.slane %v462_v34, 2 }
 0x280   :  { %v464_v37 = vadd.f32 %v463_v35, %v462_v34 }
 0x282   :  { %v465_v39 = vrot.slane %v464_v37, 1 }
 0x284   :  { %v466_v41 = vadd.f32 %v465_v39, %v464_v37 }
 0x286   :  { %v476_v42 = vadd.f32 %v475_v40, %v466_v41 }
 0x288   :  { %478 = vst.msk [vmem:[#allocation3] sm:$0x1] %vm477_vm2, %v476_v42 }
 0x289   :  { %577 = shalt.err (!%p574_p4)
}
 0x28a   :  { %488 = dma.vmem_to_hbm [thread:$0]  %s486_s15, 16, %s758_s9, [#allocation4]  }
 0x28b   :  { %586 = dma.done.wait [#allocation4], 16  }
 0x28c   :  { %587 = vsyncadd [#allocation4], 4294967280 }
 0x28d   :  { %492 = vsyncpa [#allocation4], 1 }

</bundles_post_ra>
